<compile_context>
chip_gen: v5e
topology: v5e:2x2
jax: 0.10.0
libtpu: 0.0.40
codegen_flags: <defaults>
</compile_context>

<pallas_src>
import jax
import jax.numpy as jnp
from jax import lax
from jax.experimental import pallas as pl
from jax.experimental.pallas import tpu as pltpu


def _round_up(n, m):
    return ((n + m - 1) // m) * m


def _cdiv(a, b):
    return -(-a // b)


def _forget_mult_kernel(f_ref, x_ref, h0_ref, o_ref, h_scratch):
    # Grid = (bh_chunks, time_chunks); time (axis 1) is innermost / sequential.
    t = pl.program_id(1)
    tt = f_ref.shape[0]  # static time-chunk length

    # Seed the carried state once per BH chunk.
    @pl.when(t == 0)
    def _():
        h_scratch[...] = h0_ref[...].astype(jnp.float32)

    def body(i, h):
        f_i = f_ref[i].astype(jnp.float32)   # (bh_sub, 128) dense slab
        x_i = x_ref[i].astype(jnp.float32)   # (bh_sub, 128)
        h = h + f_i * (x_i - h)              # == f*x + (1-f)*h
        o_ref[i] = h.astype(o_ref.dtype)
        return h

    h_scratch[...] = lax.fori_loop(0, tt, body, h_scratch[...],
                                   unroll=min(tt, 8))


def forget_mult(f, x, hidden_init=None, *, time_chunk=None, bh_sub_max=16):
    """Pallas TPU forget-mult. f, x: (T, B, H). Returns (T, B, H)."""
    T, B, H = f.shape
    BH = B * H
    dtype = f.dtype

    if hidden_init is None:
        # h_0 = f_0*x_0 + (1-f_0)*0 == f_0*x_0, identical to the prev_h=None path.
        hidden_init = jnp.zeros((B, H), dtype=dtype)

    # ---- BH (lane) chunking on the (T, n128, 128) view ----------------------
    n128 = _cdiv(BH, 128)
    if n128 <= max(8, bh_sub_max):
        # Single chunk spanning the full second dim: zero lane-group padding;
        # allowed by the (8,128) rule because block dim == full array dim.
        bh_sub, n128_pad, n_bh = n128, n128, 1
    else:
        # Multiple chunks: each chunk must be a multiple of 8 sublane groups.
        # Pad n128 up to a multiple of 8 and pick the largest multiple-of-8
        # divisor that still leaves >= 2 chunks (megacore on v7x).
        n128_pad = _round_up(n128, 8)
        cap = max(8, min(bh_sub_max, n128_pad // 2) // 8 * 8)
        bh_sub = 8
        for cand in range(cap, 7, -8):
            if n128_pad % cand == 0:
                bh_sub = cand
                break
        n_bh = n128_pad // bh_sub
    bh_pad = n128_pad * 128

    # ---- time chunking -------------------------------------------------------
    if time_chunk is None:
        try:  # generation-aware default: bigger chunks where VMEM allows
            vmem_cap = getattr(pltpu.get_tpu_info(), "vmem_capacity_bytes",
                               64 << 20)
        except Exception:
            vmem_cap = 64 << 20
        time_chunk = 1024 if vmem_cap >= (96 << 20) else 512
    tt = min(time_chunk, T)
    if T % tt != 0:
        # Prefer a divisor of T (skips host-side time padding + output slice).
        for cand in range(tt, max(1, tt // 2) - 1, -1):
            if T % cand == 0:
                tt = cand
                break
    t_pad = _round_up(T, tt)

    # ---- host-side layout (free reshapes; pads only when strictly needed) ---
    f2 = f.reshape(T, BH)
    x2 = x.reshape(T, BH)
    h0 = hidden_init.reshape(1, BH)
    if bh_pad != BH:
        f2 = jnp.pad(f2, ((0, 0), (0, bh_pad - BH)))
        x2 = jnp.pad(x2, ((0, 0), (0, bh_pad - BH)))
        h0 = jnp.pad(h0, ((0, 0), (0, bh_pad - BH)))
    if t_pad != T:
        # Padded tail rows have f = 0 -> carry passes through; rows sliced off.
        f2 = jnp.pad(f2, ((0, t_pad - T), (0, 0)))
        x2 = jnp.pad(x2, ((0, t_pad - T), (0, 0)))

    f3 = f2.reshape(t_pad, n128_pad, 128)
    x3 = x2.reshape(t_pad, n128_pad, 128)
    h03 = h0.reshape(n128_pad, 128)

    grid = (n_bh, t_pad // tt)

    itemsize = jnp.dtype(dtype).itemsize
    block_bytes = tt * bh_sub * 128 * itemsize
    # 3 streamed arrays (f, x, out) double-buffered + resident h0 + f32 scratch.
    footprint = 3 * 2 * block_bytes + bh_sub * 128 * (itemsize + 4)
    vmem_limit = int(min(max(32 << 20, footprint + (8 << 20)), 96 << 20))

    grid_spec = pltpu.PrefetchScalarGridSpec(
        num_scalar_prefetch=0,
        grid=grid,
        in_specs=[
            pl.BlockSpec((tt, bh_sub, 128), lambda j, t: (t, j, 0)),  # f chunk
            pl.BlockSpec((tt, bh_sub, 128), lambda j, t: (t, j, 0)),  # x chunk
            pl.BlockSpec((bh_sub, 128), lambda j, t: (j, 0)),         # hidden_init (resident)
        ],
        out_specs=pl.BlockSpec((tt, bh_sub, 128), lambda j, t: (t, j, 0)),
        scratch_shapes=[pltpu.VMEM((bh_sub, 128), jnp.float32)],      # carried h_{t-1}
    )

    out = pl.pallas_call(
        _forget_mult_kernel,
        out_shape=jax.ShapeDtypeStruct((t_pad, n128_pad, 128), dtype),
        grid_spec=grid_spec,
        compiler_params=pltpu.CompilerParams(
            # BH chunks are independent (parallel -> both TCs on v7x);
            # the time axis carries state and must stay sequential.
            dimension_semantics=("parallel", "arbitrary"),
            vmem_limit_bytes=vmem_limit,
        ),
    )(f3, x3, h03)

    out = out.reshape(t_pad, bh_pad)
    if t_pad != T or bh_pad != BH:
        out = out[:T, :BH]
    return out.reshape(T, B, H)


def _forget_mult_ref(f, x, hidden_init=None):
    """Pure-JAX reference mirroring CPUForgetMult.forward."""
    prev_h = hidden_init
    outs = []
    fx = f * x
    for t in range(f.shape[0]):
        h = fx[t]
        if prev_h is not None:
            h = h + (1.0 - f[t]) * prev_h
        outs.append(h)
        prev_h = h
    return jnp.stack(outs)


if __name__ == "__main__":
    key = jax.random.PRNGKey(0)
    keys = jax.random.split(key, 9)

    def check(T, B, H, kf, kx, kh, with_init=True):
        f = jax.nn.sigmoid(jax.random.normal(kf, (T, B, H), dtype=jnp.float32))
        x = jax.random.normal(kx, (T, B, H), dtype=jnp.float32)
        h0 = (jax.random.normal(kh, (B, H), dtype=jnp.float32)
              if with_init else None)
        out = jax.block_until_ready(forget_mult(f, x, h0))
        ref = _forget_mult_ref(f, x, h0)
        assert out.shape == (T, B, H)
        assert jnp.allclose(out, ref, atol=1e-5, rtol=1e-5), (T, B, H, with_init)

    # Primary shape: seq=8, batch=4, hidden=32  (B*H = 128 -> one lane group)
    check(8, 4, 32, keys[0], keys[1], keys[2], with_init=False)
    check(8, 4, 32, keys[0], keys[1], keys[2], with_init=True)
    # Ragged shape: exercises the lane-padding path (B*H = 60 -> pad to 128)
    check(13, 3, 20, keys[3], keys[4], keys[5], with_init=True)
    # Wider shape: dense multi-sublane slab, no padding (B*H = 1152 -> n128 = 9)
    check(6, 4, 288, keys[6], keys[7], keys[8], with_init=True)

    print("KERNEL_OK")
</pallas_src>

<mosaic_0001>
module attributes {stable_mosaic.version = 11 : i64} {
  func.func @_forget_mult_kernel(%arg0: i32, %arg1: i32, %arg2: memref<8x1x128xf32, #tpu.memory_space<vmem>>, %arg3: memref<8x1x128xf32, #tpu.memory_space<vmem>>, %arg4: memref<1x128xf32, #tpu.memory_space<vmem>>, %arg5: memref<8x1x128xf32, #tpu.memory_space<vmem>>, %arg6: memref<1x128xf32, #tpu.memory_space<vmem>>) attributes {dimension_semantics = [#tpu.dimension_semantics<parallel>, #tpu.dimension_semantics<arbitrary>], iteration_bounds = array<i64: 1, 1>, scalar_prefetch = 0 : i64, scratch_operands = 1 : i64, tpu.core_type = #tpu.core_type<tc>, window_params = [{transform_indices = @transform_0, window_bounds = array<i64: 8, 1, 128>}, {transform_indices = @transform_1, window_bounds = array<i64: 8, 1, 128>}, {transform_indices = @transform_2, window_bounds = array<i64: 1, 128>}, {transform_indices = @transform_3, window_bounds = array<i64: 8, 1, 128>}]} {
    %c0_i32 = arith.constant 0 : i32
    %0 = arith.cmpi eq, %arg1, %c0_i32 : i32
    %1 = arith.extui %0 : i1 to i32
    %c0_i32_0 = arith.constant 0 : i32
    %2 = arith.cmpi ne, %1, %c0_i32_0 : i32
    scf.if %2 {
      %c0_53 = arith.constant 0 : index
      %c0_54 = arith.constant 0 : index
      %109 = vector.load %arg4[%c0_53, %c0_54] : memref<1x128xf32, #tpu.memory_space<vmem>>, vector<1x128xf32>
      %c0_55 = arith.constant 0 : index
      %c0_56 = arith.constant 0 : index
      %110 = vector.load %arg6[%c0_55, %c0_56] : memref<1x128xf32, #tpu.memory_space<vmem>>, vector<1x128xf32>
      tpu.vector_store %arg6[%c0_55, %c0_56], %109 {strides = array<i32>} : memref<1x128xf32, #tpu.memory_space<vmem>>, vector<1x128xf32>,
    } else {
    }
    %c0 = arith.constant 0 : index
    %c0_1 = arith.constant 0 : index
    %3 = vector.load %arg6[%c0, %c0_1] : memref<1x128xf32, #tpu.memory_space<vmem>>, vector<1x128xf32>
    %c0_i32_2 = arith.constant 0 : i32
    %4 = arith.index_cast %c0_i32_2 : i32 to index
    %c0_3 = arith.constant 0 : index
    %c0_4 = arith.constant 0 : index
    %5 = vector.load %arg2[%4, %c0_3, %c0_4] : memref<8x1x128xf32, #tpu.memory_space<vmem>>, vector<1x1x128xf32>
    %6 = vector.shape_cast %5 : vector<1x1x128xf32> to vector<1x128xf32>
    %7 = arith.index_cast %c0_i32_2 : i32 to index
    %c0_5 = arith.constant 0 : index
    %c0_6 = arith.constant 0 : index
    %8 = vector.load %arg3[%7, %c0_5, %c0_6] : memref<8x1x128xf32, #tpu.memory_space<vmem>>, vector<1x1x128xf32>
    %9 = vector.shape_cast %8 : vector<1x1x128xf32> to vector<1x128xf32>
    %10 = arith.subf %9, %3 : vector<1x128xf32>
    %11 = arith.mulf %6, %10 : vector<1x128xf32>
    %12 = arith.addf %3, %11 : vector<1x128xf32>
    %13 = arith.index_cast %c0_i32_2 : i32 to index
    %c0_7 = arith.constant 0 : index
    %c0_8 = arith.constant 0 : index
    %14 = vector.load %arg5[%13, %c0_7, %c0_8] : memref<8x1x128xf32, #tpu.memory_space<vmem>>, vector<1x1x128xf32>
    %15 = vector.shape_cast %14 : vector<1x1x128xf32> to vector<1x128xf32>
    %16 = vector.shape_cast %12 : vector<1x128xf32> to vector<1x1x128xf32>
    tpu.vector_store %arg5[%13, %c0_7, %c0_8], %16 {strides = array<i32>} : memref<8x1x128xf32, #tpu.memory_space<vmem>>, vector<1x1x128xf32>,
    %c1_i32 = arith.constant 1 : i32
    %17 = arith.index_cast %c1_i32 : i32 to index
    %c0_9 = arith.constant 0 : index
    %c0_10 = arith.constant 0 : index
    %18 = vector.load %arg2[%17, %c0_9, %c0_10] : memref<8x1x128xf32, #tpu.memory_space<vmem>>, vector<1x1x128xf32>
    %19 = vector.shape_cast %18 : vector<1x1x128xf32> to vector<1x128xf32>
    %20 = arith.index_cast %c1_i32 : i32 to index
    %c0_11 = arith.constant 0 : index
    %c0_12 = arith.constant 0 : index
    %21 = vector.load %arg3[%20, %c0_11, %c0_12] : memref<8x1x128xf32, #tpu.memory_space<vmem>>, vector<1x1x128xf32>
    %22 = vector.shape_cast %21 : vector<1x1x128xf32> to vector<1x128xf32>
    %23 = arith.subf %22, %12 : vector<1x128xf32>
    %24 = arith.mulf %19, %23 : vector<1x128xf32>
    %25 = arith.addf %12, %24 : vector<1x128xf32>
    %26 = arith.index_cast %c1_i32 : i32 to index
    %c0_13 = arith.constant 0 : index
    %c0_14 = arith.constant 0 : index
    %27 = vector.load %arg5[%26, %c0_13, %c0_14] : memref<8x1x128xf32, #tpu.memory_space<vmem>>, vector<1x1x128xf32>
    %28 = vector.shape_cast %27 : vector<1x1x128xf32> to vector<1x128xf32>
    %29 = vector.shape_cast %25 : vector<1x128xf32> to vector<1x1x128xf32>
    tpu.vector_store %arg5[%26, %c0_13, %c0_14], %29 {strides = array<i32>} : memref<8x1x128xf32, #tpu.memory_space<vmem>>, vector<1x1x128xf32>,
    %c2_i32 = arith.constant 2 : i32
    %30 = arith.index_cast %c2_i32 : i32 to index
    %c0_15 = arith.constant 0 : index
    %c0_16 = arith.constant 0 : index
    %31 = vector.load %arg2[%30, %c0_15, %c0_16] : memref<8x1x128xf32, #tpu.memory_space<vmem>>, vector<1x1x128xf32>
    %32 = vector.shape_cast %31 : vector<1x1x128xf32> to vector<1x128xf32>
    %33 = arith.index_cast %c2_i32 : i32 to index
    %c0_17 = arith.constant 0 : index
    %c0_18 = arith.constant 0 : index
    %34 = vector.load %arg3[%33, %c0_17, %c0_18] : memref<8x1x128xf32, #tpu.memory_space<vmem>>, vector<1x1x128xf32>
    %35 = vector.shape_cast %34 : vector<1x1x128xf32> to vector<1x128xf32>
    %36 = arith.subf %35, %25 : vector<1x128xf32>
    %37 = arith.mulf %32, %36 : vector<1x128xf32>
    %38 = arith.addf %25, %37 : vector<1x128xf32>
    %39 = arith.index_cast %c2_i32 : i32 to index
    %c0_19 = arith.constant 0 : index
    %c0_20 = arith.constant 0 : index
    %40 = vector.load %arg5[%39, %c0_19, %c0_20] : memref<8x1x128xf32, #tpu.memory_space<vmem>>, vector<1x1x128xf32>
    %41 = vector.shape_cast %40 : vector<1x1x128xf32> to vector<1x128xf32>
    %42 = vector.shape_cast %38 : vector<1x128xf32> to vector<1x1x128xf32>
    tpu.vector_store %arg5[%39, %c0_19, %c0_20], %42 {strides = array<i32>} : memref<8x1x128xf32, #tpu.memory_space<vmem>>, vector<1x1x128xf32>,
    %c3_i32 = arith.constant 3 : i32
    %43 = arith.index_cast %c3_i32 : i32 to index
    %c0_21 = arith.constant 0 : index
    %c0_22 = arith.constant 0 : index
    %44 = vector.load %arg2[%43, %c0_21, %c0_22] : memref<8x1x128xf32, #tpu.memory_space<vmem>>, vector<1x1x128xf32>
    %45 = vector.shape_cast %44 : vector<1x1x128xf32> to vector<1x128xf32>
    %46 = arith.index_cast %c3_i32 : i32 to index
    %c0_23 = arith.constant 0 : index
    %c0_24 = arith.constant 0 : index
    %47 = vector.load %arg3[%46, %c0_23, %c0_24] : memref<8x1x128xf32, #tpu.memory_space<vmem>>, vector<1x1x128xf32>
    %48 = vector.shape_cast %47 : vector<1x1x128xf32> to vector<1x128xf32>
    %49 = arith.subf %48, %38 : vector<1x128xf32>
    %50 = arith.mulf %45, %49 : vector<1x128xf32>
    %51 = arith.addf %38, %50 : vector<1x128xf32>
    %52 = arith.index_cast %c3_i32 : i32 to index
    %c0_25 = arith.constant 0 : index
    %c0_26 = arith.constant 0 : index
    %53 = vector.load %arg5[%52, %c0_25, %c0_26] : memref<8x1x128xf32, #tpu.memory_space<vmem>>, vector<1x1x128xf32>
    %54 = vector.shape_cast %53 : vector<1x1x128xf32> to vector<1x128xf32>
    %55 = vector.shape_cast %51 : vector<1x128xf32> to vector<1x1x128xf32>
    tpu.vector_store %arg5[%52, %c0_25, %c0_26], %55 {strides = array<i32>} : memref<8x1x128xf32, #tpu.memory_space<vmem>>, vector<1x1x128xf32>,
    %c4_i32 = arith.constant 4 : i32
    %56 = arith.index_cast %c4_i32 : i32 to index
    %c0_27 = arith.constant 0 : index
    %c0_28 = arith.constant 0 : index
    %57 = vector.load %arg2[%56, %c0_27, %c0_28] : memref<8x1x128xf32, #tpu.memory_space<vmem>>, vector<1x1x128xf32>
    %58 = vector.shape_cast %57 : vector<1x1x128xf32> to vector<1x128xf32>
    %59 = arith.index_cast %c4_i32 : i32 to index
    %c0_29 = arith.constant 0 : index
    %c0_30 = arith.constant 0 : index
    %60 = vector.load %arg3[%59, %c0_29, %c0_30] : memref<8x1x128xf32, #tpu.memory_space<vmem>>, vector<1x1x128xf32>
    %61 = vector.shape_cast %60 : vector<1x1x128xf32> to vector<1x128xf32>
    %62 = arith.subf %61, %51 : vector<1x128xf32>
    %63 = arith.mulf %58, %62 : vector<1x128xf32>
    %64 = arith.addf %51, %63 : vector<1x128xf32>
    %65 = arith.index_cast %c4_i32 : i32 to index
    %c0_31 = arith.constant 0 : index
    %c0_32 = arith.constant 0 : index
    %66 = vector.load %arg5[%65, %c0_31, %c0_32] : memref<8x1x128xf32, #tpu.memory_space<vmem>>, vector<1x1x128xf32>
    %67 = vector.shape_cast %66 : vector<1x1x128xf32> to vector<1x128xf32>
    %68 = vector.shape_cast %64 : vector<1x128xf32> to vector<1x1x128xf32>
    tpu.vector_store %arg5[%65, %c0_31, %c0_32], %68 {strides = array<i32>} : memref<8x1x128xf32, #tpu.memory_space<vmem>>, vector<1x1x128xf32>,
    %c5_i32 = arith.constant 5 : i32
    %69 = arith.index_cast %c5_i32 : i32 to index
    %c0_33 = arith.constant 0 : index
    %c0_34 = arith.constant 0 : index
    %70 = vector.load %arg2[%69, %c0_33, %c0_34] : memref<8x1x128xf32, #tpu.memory_space<vmem>>, vector<1x1x128xf32>
    %71 = vector.shape_cast %70 : vector<1x1x128xf32> to vector<1x128xf32>
    %72 = arith.index_cast %c5_i32 : i32 to index
    %c0_35 = arith.constant 0 : index
    %c0_36 = arith.constant 0 : index
    %73 = vector.load %arg3[%72, %c0_35, %c0_36] : memref<8x1x128xf32, #tpu.memory_space<vmem>>, vector<1x1x128xf32>
    %74 = vector.shape_cast %73 : vector<1x1x128xf32> to vector<1x128xf32>
    %75 = arith.subf %74, %64 : vector<1x128xf32>
    %76 = arith.mulf %71, %75 : vector<1x128xf32>
    %77 = arith.addf %64, %76 : vector<1x128xf32>
    %78 = arith.index_cast %c5_i32 : i32 to index
    %c0_37 = arith.constant 0 : index
    %c0_38 = arith.constant 0 : index
    %79 = vector.load %arg5[%78, %c0_37, %c0_38] : memref<8x1x128xf32, #tpu.memory_space<vmem>>, vector<1x1x128xf32>
    %80 = vector.shape_cast %79 : vector<1x1x128xf32> to vector<1x128xf32>
    %81 = vector.shape_cast %77 : vector<1x128xf32> to vector<1x1x128xf32>
    tpu.vector_store %arg5[%78, %c0_37, %c0_38], %81 {strides = array<i32>} : memref<8x1x128xf32, #tpu.memory_space<vmem>>, vector<1x1x128xf32>,
    %c6_i32 = arith.constant 6 : i32
    %82 = arith.index_cast %c6_i32 : i32 to index
    %c0_39 = arith.constant 0 : index
    %c0_40 = arith.constant 0 : index
    %83 = vector.load %arg2[%82, %c0_39, %c0_40] : memref<8x1x128xf32, #tpu.memory_space<vmem>>, vector<1x1x128xf32>
    %84 = vector.shape_cast %83 : vector<1x1x128xf32> to vector<1x128xf32>
    %85 = arith.index_cast %c6_i32 : i32 to index
    %c0_41 = arith.constant 0 : index
    %c0_42 = arith.constant 0 : index
    %86 = vector.load %arg3[%85, %c0_41, %c0_42] : memref<8x1x128xf32, #tpu.memory_space<vmem>>, vector<1x1x128xf32>
    %87 = vector.shape_cast %86 : vector<1x1x128xf32> to vector<1x128xf32>
    %88 = arith.subf %87, %77 : vector<1x128xf32>
    %89 = arith.mulf %84, %88 : vector<1x128xf32>
    %90 = arith.addf %77, %89 : vector<1x128xf32>
    %91 = arith.index_cast %c6_i32 : i32 to index
    %c0_43 = arith.constant 0 : index
    %c0_44 = arith.constant 0 : index
    %92 = vector.load %arg5[%91, %c0_43, %c0_44] : memref<8x1x128xf32, #tpu.memory_space<vmem>>, vector<1x1x128xf32>
    %93 = vector.shape_cast %92 : vector<1x1x128xf32> to vector<1x128xf32>
    %94 = vector.shape_cast %90 : vector<1x128xf32> to vector<1x1x128xf32>
    tpu.vector_store %arg5[%91, %c0_43, %c0_44], %94 {strides = array<i32>} : memref<8x1x128xf32, #tpu.memory_space<vmem>>, vector<1x1x128xf32>,
    %c7_i32 = arith.constant 7 : i32
    %95 = arith.index_cast %c7_i32 : i32 to index
    %c0_45 = arith.constant 0 : index
    %c0_46 = arith.constant 0 : index
    %96 = vector.load %arg2[%95, %c0_45, %c0_46] : memref<8x1x128xf32, #tpu.memory_space<vmem>>, vector<1x1x128xf32>
    %97 = vector.shape_cast %96 : vector<1x1x128xf32> to vector<1x128xf32>
    %98 = arith.index_cast %c7_i32 : i32 to index
    %c0_47 = arith.constant 0 : index
    %c0_48 = arith.constant 0 : index
    %99 = vector.load %arg3[%98, %c0_47, %c0_48] : memref<8x1x128xf32, #tpu.memory_space<vmem>>, vector<1x1x128xf32>
    %100 = vector.shape_cast %99 : vector<1x1x128xf32> to vector<1x128xf32>
    %101 = arith.subf %100, %90 : vector<1x128xf32>
    %102 = arith.mulf %97, %101 : vector<1x128xf32>
    %103 = arith.addf %90, %102 : vector<1x128xf32>
    %104 = arith.index_cast %c7_i32 : i32 to index
    %c0_49 = arith.constant 0 : index
    %c0_50 = arith.constant 0 : index
    %105 = vector.load %arg5[%104, %c0_49, %c0_50] : memref<8x1x128xf32, #tpu.memory_space<vmem>>, vector<1x1x128xf32>
    %106 = vector.shape_cast %105 : vector<1x1x128xf32> to vector<1x128xf32>
    %107 = vector.shape_cast %103 : vector<1x128xf32> to vector<1x1x128xf32>
    tpu.vector_store %arg5[%104, %c0_49, %c0_50], %107 {strides = array<i32>} : memref<8x1x128xf32, #tpu.memory_space<vmem>>, vector<1x1x128xf32>,
    %c8_i32 = arith.constant 8 : i32
    %c0_51 = arith.constant 0 : index
    %c0_52 = arith.constant 0 : index
    %108 = vector.load %arg6[%c0_51, %c0_52] : memref<1x128xf32, #tpu.memory_space<vmem>>, vector<1x128xf32>
    tpu.vector_store %arg6[%c0_51, %c0_52], %103 {strides = array<i32>} : memref<1x128xf32, #tpu.memory_space<vmem>>, vector<1x128xf32>,
    return
  }
  func.func @transform_0(%arg0: i32, %arg1: i32) -> (i32, i32, i32) {
    %c0_i32 = arith.constant 0 : i32
    %c0_i32_0 = arith.constant 0 : i32
    return %arg1, %arg0, %c0_i32 : i32, i32, i32
  }
  func.func @transform_1(%arg0: i32, %arg1: i32) -> (i32, i32, i32) {
    %c0_i32 = arith.constant 0 : i32
    %c0_i32_0 = arith.constant 0 : i32
    return %arg1, %arg0, %c0_i32 : i32, i32, i32
  }
  func.func @transform_2(%arg0: i32, %arg1: i32) -> (i32, i32) {
    %c0_i32 = arith.constant 0 : i32
    %c0_i32_0 = arith.constant 0 : i32
    return %arg0, %c0_i32 : i32, i32
  }
  func.func @transform_3(%arg0: i32, %arg1: i32) -> (i32, i32, i32) {
    %c0_i32 = arith.constant 0 : i32
    %c0_i32_0 = arith.constant 0 : i32
    return %arg1, %arg0, %c0_i32 : i32, i32, i32
  }
}

</mosaic_0001>

<bundles_post_ra>
// kernel: tpu_custom_call.1
= control target key start
LH: loop header
LB: loop body
LE: loop exit
PB: predicated region body
PF: predicated region fallthrough
CT: control target
= control target key end

     0   :  { %8 = vsyncpa [#allocation4], 0  ;;  %s273_s0 = inlined_call_operand.hbm [shape: f32[8,1,128], index: 0, kind: input, shape index: {}]   ;;  %s274_s1 = inlined_call_operand.hbm [shape: f32[8,1,128], index: 1, kind: input, shape index: {}]   ;;  %s275_s2 = inlined_call_operand.vmem [shape: f32[1,128], index: 2, kind: input, shape index: {}]   ;;  %s276_s3 = inlined_call_operand.hbm [shape: f32[8,1,128], index: 3, kind: output, shape index: {}]  }
   0x1   :  { %9 = vsyncpa [#allocation7], 0 }
   0x2   :  { %10 = vsyncpa [#allocation5], 0  ;;  %s15_s14 = sshll.u32 %s273_s0, 4  ;;  %s227_s15 = smov [#allocation3]   ;;  %s16_s14 = int_to_ptr.hbm [resolvable:$true] %s15_s14 }
   0x3   :  { %s17_s16 = sshll.u32 %s227_s15, 4  ;;  %s28_s19 = sshll.u32 %s274_s1, 4  ;;  %s18_s16 = int_to_ptr.vmem [resolvable:$true] %s17_s16  ;;  %s29_s19 = int_to_ptr.hbm [resolvable:$true] %s28_s19 }
   0x4   :  { %s228_s20 = smov 16   ;;  %s229_s21 = smov 1  }
   0x5   :  { %23 = dma.hbm_to_vmem [thread:$0]  %s16_s14, 128, %s18_s16, [#allocation4], %s228_s20, %s228_s20, %s229_s21  }
   0x6   :  { %s230_s22 = smov [#allocation6]  }
   0x7   :  { %s30_s23 = sshll.u32 %s230_s22, 4  ;;  %s31_s23 = int_to_ptr.vmem [resolvable:$true] %s30_s23 }
   0x8   :  { %36 = dma.hbm_to_vmem [thread:$0]  %s29_s19, 128, %s31_s23, [#allocation7], %s228_s20, %s228_s20, %s229_s21  }
   0x9   :  { %221 = dma.done.wait [#allocation4], 128  }
   0xa   :  { %222 = vsyncadd [#allocation4], 4294967168 }
   0xb   :  { %223 = dma.done.wait [#allocation7], 128  }
   0xc   :  { %224 = vsyncadd [#allocation7], 4294967168  ;;  %v51_v0 = vld [vmem:[%s275_s2] sm:$0x1]  ;;  %v55_v1 = vld [vmem:[#allocation6] sm:$0x1] }
   0xd   :  { %52 = vst [vmem:[#allocation2] sm:$0x1] %v51_v0  ;;  %v54_v3 = vld [vmem:[#allocation3] sm:$0x1]  ;;  %v63_v6 = vld [vmem:[#allocation6 + $0x1] sm:$0x1] }
   0xe   :  { %v61_v8 = vld [vmem:[#allocation3 + $0x1] sm:$0x1]  ;;  %v72_v11 = vld [vmem:[#allocation6 + $0x2] sm:$0x1]  ;;  %v70_v13 = vld [vmem:[#allocation3 + $0x2] sm:$0x1] }
   0xf   :  { %v81_v16 = vld [vmem:[#allocation6 + $0x3] sm:$0x1]  ;;  %v79_v18 = vld [vmem:[#allocation3 + $0x3] sm:$0x1]  ;;  %v90_v21 = vld [vmem:[#allocation6 + $0x4] sm:$0x1] }
  0x10   :  { %v88_v23 = vld [vmem:[#allocation3 + $0x4] sm:$0x1]  ;;  %v99_v26 = vld [vmem:[#allocation6 + $0x5] sm:$0x1]  ;;  %v97_v28 = vld [vmem:[#allocation3 + $0x5] sm:$0x1] }
  0x11   :  { %v108_v31 = vld [vmem:[#allocation6 + $0x6] sm:$0x1]  ;;  %v106_v33 = vld [vmem:[#allocation3 + $0x6] sm:$0x1]  ;;  %v117_v36 = vld [vmem:[#allocation6 + $0x7] sm:$0x1] }
  0x12   :  { %v115_v38 = vld [vmem:[#allocation3 + $0x7] sm:$0x1]  ;;  %s231_s2 = smov [#allocation8]   ;;  %s130_s27 = sshll.u32 %s276_s3, 4  ;;  %s131_s27 = int_to_ptr.hbm [resolvable:$true] %s130_s27 }
  0x13   :  { %s128_s24 = sshll.u32 %s231_s2, 4  ;;  %s129_s24 = int_to_ptr.vmem [resolvable:$true] %s128_s24 }
  0x14   :  { %v53_v2 = vld [vmem:[#allocation2] sm:$0x1] }
  0x15   :  { %v56_v4 = vsub.f32 %v55_v1, %v53_v2 }
  0x17   :  { %v57_v5 = vmul.f32 %v56_v4, %v54_v3 }
  0x19   :  { %v58_v7 = vadd.f32 %v57_v5, %v53_v2 }
  0x1b   :  { %59 = vst [vmem:[#allocation8] sm:$0x1] %v58_v7  ;;  %v64_v9 = vsub.f32 %v63_v6, %v58_v7 }
  0x1d   :  { %v65_v10 = vmul.f32 %v64_v9, %v61_v8 }
  0x1f   :  { %v66_v12 = vadd.f32 %v65_v10, %v58_v7 }
  0x21   :  { %68 = vst [vmem:[#allocation8 + $0x1] sm:$0x1] %v66_v12  ;;  %v73_v14 = vsub.f32 %v72_v11, %v66_v12 }
  0x23   :  { %v74_v15 = vmul.f32 %v73_v14, %v70_v13 }
  0x25   :  { %v75_v17 = vadd.f32 %v74_v15, %v66_v12 }
  0x27   :  { %77 = vst [vmem:[#allocation8 + $0x2] sm:$0x1] %v75_v17  ;;  %v82_v19 = vsub.f32 %v81_v16, %v75_v17 }
  0x29   :  { %v83_v20 = vmul.f32 %v82_v19, %v79_v18 }
  0x2b   :  { %v84_v22 = vadd.f32 %v83_v20, %v75_v17 }
  0x2d   :  { %86 = vst [vmem:[#allocation8 + $0x3] sm:$0x1] %v84_v22  ;;  %v91_v24 = vsub.f32 %v90_v21, %v84_v22 }
  0x2f   :  { %v92_v25 = vmul.f32 %v91_v24, %v88_v23 }
  0x31   :  { %v93_v27 = vadd.f32 %v92_v25, %v84_v22 }
  0x33   :  { %95 = vst [vmem:[#allocation8 + $0x4] sm:$0x1] %v93_v27  ;;  %v100_v29 = vsub.f32 %v99_v26, %v93_v27 }
  0x35   :  { %v101_v30 = vmul.f32 %v100_v29, %v97_v28 }
  0x37   :  { %v102_v32 = vadd.f32 %v101_v30, %v93_v27 }
  0x39   :  { %104 = vst [vmem:[#allocation8 + $0x5] sm:$0x1] %v102_v32  ;;  %v109_v34 = vsub.f32 %v108_v31, %v102_v32 }
  0x3b   :  { %v110_v35 = vmul.f32 %v109_v34, %v106_v33 }
  0x3d   :  { %v111_v37 = vadd.f32 %v110_v35, %v102_v32 }
  0x3f   :  { %113 = vst [vmem:[#allocation8 + $0x6] sm:$0x1] %v111_v37  ;;  %v118_v39 = vsub.f32 %v117_v36, %v111_v37 }
  0x41   :  { %v119_v40 = vmul.f32 %v118_v39, %v115_v38 }
  0x43   :  { %v120_v41 = vadd.f32 %v119_v40, %v111_v37 }
  0x45   :  { %122 = vst [vmem:[#allocation8 + $0x7] sm:$0x1] %v120_v41 }
  0x46   :  { %123 = vst [vmem:[#allocation2] sm:$0x1] %v120_v41  ;;  %136 = dma.vmem_to_hbm [thread:$0]  %s129_s24, 128, %s131_s27, [#allocation5], %s228_s20, %s228_s20, %s229_s21  }
  0x47   :  { %225 = dma.done.wait [#allocation5], 128  }
  0x48   :  { %226 = vsyncadd [#allocation5], 4294967168 }
  0x49   :  { %141 = vsyncpa [#allocation4], 1 }
  0x4a   :  { %142 = vsyncpa [#allocation7], 1 }
  0x4b   :  { %143 = vsyncpa [#allocation5], 1 }

</bundles_post_ra>
